<compile_context>
chip_gen: v7x
topology: tpu7x:2x2x1
jax: 0.10.0
libtpu: 0.0.40
codegen_flags: <defaults>
</compile_context>

<pallas_src>
import functools
import numpy as np
import jax
import jax.numpy as jnp
from jax.experimental import pallas as pl
from jax.experimental.pallas import tpu as pltpu


def _round_up(n, m):
    return pl.cdiv(n, m) * m


# ----------------------------------------------------------------------------
# Kernel: one batch tile of  cat([x, x @ W + b], axis=1)
# ----------------------------------------------------------------------------
def encblock_kernel(x_ref, w_ref, b_ref, o_ref, *, in_pad):
    x = x_ref[...]                                           # (B_TILE, IN_PAD) f32
    # Linear: bf16 inputs on the MXU, f32 accumulation, f32 bias add.
    y = jnp.dot(x.astype(jnp.bfloat16), w_ref[...],
                preferred_element_type=jnp.float32) + b_ref[...]
    # torch.cat([x, out], dim=1), laid out at 128-aligned column offsets.
    o_ref[:, :in_pad] = x
    o_ref[:, in_pad:] = y


# ----------------------------------------------------------------------------
# Wrapper: padding / tiling glue around the pallas_call
# ----------------------------------------------------------------------------
def encblock_forward_pallas(x, weight, bias, *, b_tile=512):
    """x: (B, in_features) f32; weight: (out_features, in_features); bias: (out_features,).
    Returns (B, in_features + out_features) f32 == torch.cat([x, x @ W.T + b], 1)."""
    B, fin = x.shape
    fout = weight.shape[0]

    in_pad = _round_up(fin, 128)
    out_pad = _round_up(fout, 128)
    b_tile = min(b_tile, _round_up(B, 8))          # sublane-aligned batch tile
    b_pad = _round_up(B, b_tile)

    # zero-pad to lane-dense shapes (zeros contribute 0 to the matmul)
    x_p = jnp.zeros((b_pad, in_pad), jnp.float32).at[:B, :fin].set(x)
    w_p = (jnp.zeros((in_pad, out_pad), jnp.float32)
           .at[:fin, :fout].set(weight.T).astype(jnp.bfloat16))
    b_p = jnp.zeros((1, out_pad), jnp.float32).at[0, :fout].set(bias)

    grid = (b_pad // b_tile,)
    kernel = functools.partial(encblock_kernel, in_pad=in_pad)

    flops = 2 * b_pad * in_pad * out_pad
    bytes_accessed = (x_p.size * 4 + w_p.size * 2 + b_p.size * 4
                      + b_pad * (in_pad + out_pad) * 4)

    out = pl.pallas_call(
        kernel,
        out_shape=jax.ShapeDtypeStruct((b_pad, in_pad + out_pad), jnp.float32),
        grid=grid,
        in_specs=[
            pl.BlockSpec((b_tile, in_pad), lambda i: (i, 0)),     # x: batch-tiled
            pl.BlockSpec((in_pad, out_pad), lambda i: (0, 0)),    # W: VMEM-resident
            pl.BlockSpec((1, out_pad), lambda i: (0, 0)),         # b: VMEM-resident
        ],
        out_specs=pl.BlockSpec((b_tile, in_pad + out_pad), lambda i: (i, 0)),
        compiler_params=pltpu.CompilerParams(dimension_semantics=("parallel",)),
        cost_estimate=pl.CostEstimate(flops=flops, transcendentals=0,
                                      bytes_accessed=bytes_accessed),
    )(x_p, w_p, b_p)

    # strip batch / lane padding; both halves sit at 128-aligned offsets
    return jnp.concatenate([out[:B, :fin], out[:B, in_pad:in_pad + fout]], axis=1)


# ----------------------------------------------------------------------------
# Pure-JAX reference (EncBlock.forward)
# ----------------------------------------------------------------------------
def encblock_forward_ref(x, weight, bias):
    out = x @ weight.T + bias
    return jnp.concatenate([x, out], axis=1)


# ----------------------------------------------------------------------------
if __name__ == "__main__":
    key = jax.random.PRNGKey(0)
    k_x, k_w, k_b = jax.random.split(key, 3)

    B, in_features, out_features = 2, 84, 84        # Linear(84, 84), as in the model
    bound = 1.0 / np.sqrt(in_features)               # PyTorch default Linear init range
    x = jax.random.normal(k_x, (B, in_features), jnp.float32)
    weight = jax.random.uniform(k_w, (out_features, in_features), jnp.float32, -bound, bound)
    bias = jax.random.uniform(k_b, (out_features,), jnp.float32, -bound, bound)

    out = jax.block_until_ready(encblock_forward_pallas(x, weight, bias))
    ref = jax.block_until_ready(encblock_forward_ref(x, weight, bias))

    assert out.shape == (B, in_features + out_features)
    # bf16 matmul inputs with f32 accumulation -> loosened (but still tight) tolerance
    np.testing.assert_allclose(np.asarray(out), np.asarray(ref), rtol=2e-2, atol=1e-2)

    print("KERNEL_OK")
</pallas_src>

<mosaic_0001>
module attributes {stable_mosaic.version = 11 : i64} {
  func.func @encblock_kernel(%arg0: i32, %arg1: memref<8x128xf32, #tpu.memory_space<vmem>>, %arg2: memref<128x128xbf16, #tpu.memory_space<vmem>>, %arg3: memref<1x128xf32, #tpu.memory_space<vmem>>, %arg4: memref<8x256xf32, #tpu.memory_space<vmem>>) attributes {dimension_semantics = [#tpu.dimension_semantics<parallel>], iteration_bounds = array<i64: 1>, scalar_prefetch = 0 : i64, scratch_operands = 0 : i64, tpu.core_type = #tpu.core_type<tc>, window_params = [{transform_indices = @transform_0, window_bounds = array<i64: 8, 128>}, {pipeline_mode = #tpu.pipeline_mode<synchronous>, transform_indices = @transform_1, window_bounds = array<i64: 128, 128>}, {pipeline_mode = #tpu.pipeline_mode<synchronous>, transform_indices = @transform_2, window_bounds = array<i64: 1, 128>}, {transform_indices = @transform_3, window_bounds = array<i64: 8, 256>}]} {
    %c0 = arith.constant 0 : index
    %c0_0 = arith.constant 0 : index
    %0 = vector.load %arg1[%c0, %c0_0] : memref<8x128xf32, #tpu.memory_space<vmem>>, vector<8x128xf32>
    %1 = arith.truncf %0 : vector<8x128xf32> to vector<8x128xbf16>
    %c0_1 = arith.constant 0 : index
    %c0_2 = arith.constant 0 : index
    %2 = vector.load %arg2[%c0_1, %c0_2] : memref<128x128xbf16, #tpu.memory_space<vmem>>, vector<128x128xbf16>
    %cst = arith.constant dense<0.000000e+00> : vector<8x128xf32>
    %3 = tpu.matmul %1, %2, %cst {dimension_numbers = #tpu.dot_dimension_numbers<[1], [0], [0], [1], [0, 0, 1, 1], [], []>} : vector<8x128xbf16>, vector<128x128xbf16>, vector<8x128xf32> -> vector<8x128xf32>
    %c0_3 = arith.constant 0 : index
    %c0_4 = arith.constant 0 : index
    %4 = vector.load %arg3[%c0_3, %c0_4] : memref<1x128xf32, #tpu.memory_space<vmem>>, vector<1x128xf32>
    %5 = vector.broadcast %4 : vector<1x128xf32> to vector<8x128xf32>
    %6 = arith.addf %3, %5 : vector<8x128xf32>
    %c0_5 = arith.constant 0 : index
    %c0_6 = arith.constant 0 : index
    %7 = vector.load %arg4[%c0_5, %c0_6] : memref<8x256xf32, #tpu.memory_space<vmem>>, vector<8x128xf32>
    tpu.vector_store %arg4[%c0_5, %c0_6], %0 {strides = array<i32>} : memref<8x256xf32, #tpu.memory_space<vmem>>, vector<8x128xf32>,
    %c0_7 = arith.constant 0 : index
    %c128 = arith.constant 128 : index
    %8 = vector.load %arg4[%c0_7, %c128] : memref<8x256xf32, #tpu.memory_space<vmem>>, vector<8x128xf32>
    tpu.vector_store %arg4[%c0_7, %c128], %6 {strides = array<i32>} : memref<8x256xf32, #tpu.memory_space<vmem>>, vector<8x128xf32>,
    return
  }
  func.func @transform_0(%arg0: i32) -> (i32, i32) {
    %c0_i32 = arith.constant 0 : i32
    %c0_i32_0 = arith.constant 0 : i32
    return %arg0, %c0_i32 : i32, i32
  }
  func.func @transform_1(%arg0: i32) -> (i32, i32) {
    %c0_i32 = arith.constant 0 : i32
    %c0_i32_0 = arith.constant 0 : i32
    %c0_i32_1 = arith.constant 0 : i32
    return %c0_i32, %c0_i32_0 : i32, i32
  }
  func.func @transform_2(%arg0: i32) -> (i32, i32) {
    %c0_i32 = arith.constant 0 : i32
    %c0_i32_0 = arith.constant 0 : i32
    %c0_i32_1 = arith.constant 0 : i32
    return %c0_i32, %c0_i32_0 : i32, i32
  }
  func.func @transform_3(%arg0: i32) -> (i32, i32) {
    %c0_i32 = arith.constant 0 : i32
    %c0_i32_0 = arith.constant 0 : i32
    return %arg0, %c0_i32 : i32, i32
  }
}

</mosaic_0001>

<bundles_post_ra>
// kernel: tpu_custom_call.1
= control target key start
LH: loop header
LB: loop body
LE: loop exit
PB: predicated region body
PF: predicated region fallthrough
CT: control target
= control target key end

     0   :  { %8 = vsyncpa [#allocation3], 0  ;;  %s371_s0 = inlined_call_operand.hbm [shape: f32[8,128], index: 0, kind: input, shape index: {}]   ;;  %s372_s1 = inlined_call_operand.hbm [shape: bf16[128,128], index: 1, kind: input, shape index: {}]   ;;  %s373_s2 = inlined_call_operand.vmem [shape: f32[1,128], index: 2, kind: input, shape index: {}]   ;;  %s374_s3 = inlined_call_operand.hbm [shape: f32[8,256], index: 3, kind: output, shape index: {}]  }
   0x1   :  { %9 = vsyncpa [#allocation6], 0 }
   0x2   :  { %10 = vsyncpa [#allocation4], 0  ;;  %s298_s12 = smov [#allocation2]   ;;  %s299_s14 = smov [#allocation5]  }
   0x3   :  { %s17_s13 = sshll.u32 %s298_s12, 4  ;;  %s26_s15 = sshll.u32 %s299_s14, 4  ;;  %s18_s13 = int_to_ptr.vmem [resolvable:$true] %s17_s13  ;;  %s325_s15 = int_to_ptr.vmem [resolvable:$true] %s26_s15 }
   0x4   :  { %s226_s18 = scalar_lea.hbm %s371_s0, 128 }
   0x5   :  { %p227_p0 = scmp.ne.s32.totalorder %s371_s0, %s226_s18  ;;  %p230_p1 = scmp.lt.u32.totalorder %s226_s18, %s371_s0 }
   0x7   :  { %p232_p2 = pnand %p230_p1, %p227_p0 }
   0x9   :  { %235 = shalt.err (!%p232_p2)
}
   0xa   :  { %s236_s23 = scalar_lea.vmem %s18_s13, 128  ;;  %p241_p4 = scmp.lt.s32.totalorder %s18_s13, %s18_s13 }
   0xb   :  { %p237_p3 = scmp.ne.s32.totalorder %s18_s13, %s236_s23  ;;  %p242_p5 = scmp.lt.s32.totalorder %s236_s23, %s236_s23 }
   0xd   :  { %p243_p6 = por %p242_p5, %p241_p4 }
   0xf   :  { %p244_p7 = pnand %p243_p6, %p237_p3 }
  0x11   :  { %247 = shalt.err (!%p244_p7)
}
  0x12   :  { %20 = dma.hbm_to_vmem [thread:$0]  %s371_s0, 128, %s18_s13, [#allocation3]  }
  0x13   :  { %s248_s28 = scalar_lea.hbm %s372_s1, 1024 }
  0x14   :  { %p249_p8 = scmp.ne.s32.totalorder %s372_s1, %s248_s28  ;;  %p252_p9 = scmp.lt.u32.totalorder %s248_s28, %s372_s1 }
  0x16   :  { %p254_p10 = pnand %p252_p9, %p249_p8 }
  0x18   :  { %257 = shalt.err (!%p254_p10)
}
  0x19   :  { %s258_s6 = scalar_lea.vmem %s325_s15, 1024  ;;  %p263_p12 = scmp.lt.s32.totalorder %s325_s15, %s325_s15 }
  0x1a   :  { %p259_p11 = scmp.ne.s32.totalorder %s325_s15, %s258_s6  ;;  %p264_p13 = scmp.lt.s32.totalorder %s258_s6, %s258_s6 }
  0x1c   :  { %p265_p0 = por %p264_p13, %p263_p12 }
  0x1e   :  { %p266_p1 = pnand %p265_p0, %p259_p11 }
  0x20   :  { %269 = shalt.err (!%p266_p1)
}
  0x21   :  { %s300_s0 = smov 64   ;;  %s301_s7 = smov 4  }
  0x22   :  { %32 = dma.hbm_to_vmem [thread:$0]  %s372_s1, 1024, %s325_s15, [#allocation6], %s300_s0, %s300_s0, %s301_s7  }
  0x23   :  { %292 = dma.done.wait [#allocation3], 128  }
  0x24   :  { %293 = vsyncadd [#allocation3], 4294967168 }
  0x25   :  { %294 = dma.done.wait [#allocation6], 1024  }
  0x26   :  { %295 = vsyncadd [#allocation6], 4294966272  ;;  %v302_v0 = vmov 0.0   ;;  %vm303_vm0 = vmmov 0   ;;  %v218_v1 = vld [vmem:[#allocation5] sm:$0xff]   ;;  %v219_v2 = vld [vmem:[#allocation5 + $0x8] sm:$0xff]  }
  0x27   :  { %191 = vmatprep.subr.bf16.mxu0 %v302_v0  ;;  %207 = vmatprep.mubr.msk.bf16.mxu0 %vm303_vm0, %v302_v0  ;;  %v220_v3 = vld [vmem:[#allocation5 + $0x10] sm:$0xff]   ;;  %v42_v4 = vld [vmem:[#allocation2] sm:$0xff]  ;;  %v222_v6 = vld [vmem:[#allocation5 + $0x20] sm:$0xff]   ;;  %s304_s11 = smov [#allocation7]  }
  0x28   :  { %192 = vmatpush3.bf16.msra.mxu0 %v218_v1  ;;  %155 = vst [vmem:[#allocation7] sm:$0xff] %v42_v4  ;;  %v221_v5 = vld [vmem:[#allocation5 + $0x18] sm:$0xff]   ;;  %v223_v7 = vld [vmem:[#allocation5 + $0x28] sm:$0xff]   ;;  %v224_v8 = vld [vmem:[#allocation5 + $0x30] sm:$0xff]   ;;  %v43_v10 = vpack.c.bf16 %v42_v4, %v42_v4  ;;  %s163_s12 = sshll.u32 %s304_s11, 4  ;;  %s164_s12 = int_to_ptr.vmem [resolvable:$true] %s163_s12 }
  0x29   :  { %193 = vmatprep.subr.bf16.mxu0 %v302_v0  ;;  %v225_v9 = vld [vmem:[#allocation5 + $0x38] sm:$0xff]   ;;  %s270_s13 = scalar_lea.vmem %s164_s12, 256  ;;  %p275_p3 = scmp.lt.s32.totalorder %s164_s12, %s164_s12 }
  0x2a   :  { %v173_v11 = vld [vmem:[%s373_s2] ss:$0 sm:$0xff]  ;;  %p271_p2 = scmp.ne.s32.totalorder %s164_s12, %s270_s13  ;;  %p276_p4 = scmp.lt.s32.totalorder %s270_s13, %s270_s13 }
  0x2c   :  { %194 = vmatpush3.bf16.msra.mxu0 %v219_v2  ;;  %p277_p5 = por %p276_p4, %p275_p3 }
  0x2d   :  { %195 = vmatprep.subr.bf16.mxu0 %v302_v0 }
  0x2e   :  { %p278_p6 = pnand %p277_p5, %p271_p2 }
  0x30   :  { %196 = vmatpush3.bf16.msra.mxu0 %v220_v3 }
  0x31   :  { %197 = vmatprep.subr.bf16.mxu0 %v302_v0 }
  0x34   :  { %198 = vmatpush3.bf16.msra.mxu0 %v221_v5 }
  0x35   :  { %199 = vmatprep.subr.bf16.mxu0 %v302_v0 }
  0x38   :  { %200 = vmatpush3.bf16.msra.mxu0 %v222_v6 }
  0x39   :  { %201 = vmatprep.subr.bf16.mxu0 %v302_v0 }
  0x3c   :  { %202 = vmatpush3.bf16.msra.mxu0 %v223_v7 }
  0x3d   :  { %203 = vmatprep.subr.bf16.mxu0 %v302_v0 }
  0x40   :  { %204 = vmatpush3.bf16.msra.mxu0 %v224_v8 }
  0x41   :  { %205 = vmatprep.subr.bf16.mxu0 %v302_v0 }
  0x44   :  { %206 = vmatpush3.bf16.msra.mxu0 %v225_v9 }
  0x47   :  { %208 = vmatmul.mubr.bf16.vlgmr.msra.gmra.mrb[0].mxu0 %v43_v10 }
 0x11a   :  { %v149_v12 = vpop.f32.mrb[0].mxu0 }
 0x11b   :  { %v150_v13 = vadd.f32 %v173_v11, %v149_v12  ;;  %v209_v14 = vpop.f32.mrb[1].mxu0 }
 0x11c   :  { %v152_v15 = vpop.f32.mrb[2].mxu0 }
 0x11d   :  { %156 = vst [vmem:[#allocation7 + $0x8] sm:$0xff] %v150_v13  ;;  %v210_v16 = vpop.f32.mrb[3].mxu0 }
 0x11e   :  { %281 = shalt.err (!%p278_p6)
}
 0x11f   :  { %s282_s2 = scalar_lea.hbm %s374_s3, 256 }
 0x120   :  { %p283_p7 = scmp.ne.s32.totalorder %s374_s3, %s282_s2  ;;  %p286_p8 = scmp.lt.u32.totalorder %s282_s2, %s374_s3 }
 0x122   :  { %p288_p9 = pnand %p286_p8, %p283_p7 }
 0x124   :  { %291 = shalt.err (!%p288_p9)
}
 0x125   :  { %166 = dma.vmem_to_hbm [thread:$0]  %s164_s12, 256, %s374_s3, [#allocation4]  }
 0x126   :  { %296 = dma.done.wait [#allocation4], 256  }
 0x127   :  { %297 = vsyncadd [#allocation4], 4294967040 }
 0x128   :  { %170 = vsyncpa [#allocation3], 1 }
 0x129   :  { %171 = vsyncpa [#allocation6], 1 }
 0x12a   :  { %172 = vsyncpa [#allocation4], 1 }

</bundles_post_ra>
